<compile_context>
chip_gen: v7x
topology: tpu7x:2x2x1
jax: 0.10.0
libtpu: 0.0.40
codegen_flags: <defaults>
</compile_context>

<pallas_src>
import math

import jax
import jax.numpy as jnp
from jax.experimental import pallas as pl
from jax.experimental.pallas import tpu as pltpu


# ---------------------------------------------------------------------------
# PE table construction (host/XLA side, done once — NOT inside the kernel)
# ---------------------------------------------------------------------------
def make_positional_encoding(embeddingDim: int = 32,
                             numTokens: int = 120,
                             n: float = 10.0,
                             maxDeviation: float = 0.1) -> jnp.ndarray:
    """Replicates the PyTorch module's registered buffer exactly."""
    assert embeddingDim % 2 == 0 or embeddingDim == 1, "embeddingDim must be even"
    sinusoidal_indices = jnp.arange(0, embeddingDim, 2, dtype=jnp.float32)
    # exponentialPositionalEncoding: exp(i * (-log(n) / embeddingDim))
    sinusoidal_decay = jnp.exp(sinusoidal_indices * (-math.log(n) / embeddingDim))
    position_indices = jnp.arange(0, numTokens, dtype=jnp.float32)[:, None]
    angles = position_indices * sinusoidal_decay               # (numTokens, D/2)
    pe = jnp.zeros((numTokens, embeddingDim), dtype=jnp.float32)
    pe = pe.at[:, 0::2].set(jnp.sin(angles) * maxDeviation)
    if embeddingDim > 1:
        pe = pe.at[:, 1::2].set(jnp.cos(angles) * maxDeviation)
    return pe
    # TODO(synk): assertUniquePositions / plotting are init-time checks with no
    # kernel equivalent; omitted from the forward path.


# ---------------------------------------------------------------------------
# Kernel: pure broadcast add (VPU only)
# ---------------------------------------------------------------------------
def _pe_add_kernel(x_ref, pe_ref, o_ref):
    # x_ref / o_ref : (TB, tile_rows, 128)    pe_ref : (tile_rows, 128)
    o_ref[...] = x_ref[...] + pe_ref[...][None, :, :]


_LANE = 128
_BLOCK_CAP_BYTES = 2 * 1024 * 1024   # per activation block (already at BW plateau)


# ---------------------------------------------------------------------------
# Wrapper
# ---------------------------------------------------------------------------
def positional_encoding_forward(x: jnp.ndarray,
                                pe_table: jnp.ndarray,
                                *,
                                donate_input: bool = False) -> jnp.ndarray:
    """x: (batch, sequenceLength, embeddingDim); pe_table: (numTokens, embeddingDim)."""
    B, S, D = x.shape
    num_tokens, emb_dim = pe_table.shape
    assert S <= num_tokens, "You have too many timepoints in your signal."
    assert D == emb_dim, "Your signals do not match the expected embedding dimension."

    # Cast PE to the activation dtype once.  NOTE: for sub-f32 activations this
    # rounds PE before the add (PyTorch adds the f32 buffer then downcasts) —
    # negligible for a 0.1-scaled positional encoding.
    pe = pe_table[:S, :].astype(x.dtype)

    itemsize = jnp.dtype(x.dtype).itemsize
    sub_align = {4: 8, 2: 16, 1: 32}.get(itemsize, 8)   # dtype-aware sublane align

    # Lane-dense re-layout: fold (S, D) row-major into rows of 128 lanes; pad the
    # flattened per-batch axis to a multiple of 128 if needed (x and PE padded
    # consistently, padding sliced off afterwards).
    n = S * D
    n_pad = ((n + _LANE - 1) // _LANE) * _LANE
    x_flat = x.reshape(B, n)
    pe_flat = pe.reshape(n)
    if n_pad != n:
        x_flat = jnp.pad(x_flat, ((0, 0), (0, n_pad - n)))
        pe_flat = jnp.pad(pe_flat, (0, n_pad - n))
    rows = n_pad // _LANE
    x_k = x_flat.reshape(B, rows, _LANE)
    pe_k = pe_flat.reshape(rows, _LANE)

    bytes_per_row = _LANE * itemsize
    max_rows_per_block = max(sub_align, _BLOCK_CAP_BYTES // bytes_per_row)

    if rows <= max_rows_per_block:
        # Whole per-batch slab fits in one block; pack several batches per grid
        # step so the fixed per-step overhead amortizes over a bigger block.
        tile_rows = rows                       # full extent -> always layout-legal
        grid_r = 1
        per_batch_bytes = rows * bytes_per_row
        tb = int(max(1, min(B, _BLOCK_CAP_BYTES // max(1, per_batch_bytes))))
        grid_b = pl.cdiv(B, tb)
    else:
        # Large sequences: tile rows (dtype-aligned), one batch per step.
        tile_rows = (max_rows_per_block // sub_align) * sub_align
        grid_r = pl.cdiv(rows, tile_rows)
        tb = 1
        grid_b = B

    # Row-tile axis OUTER, batch axis INNER: PE block index (r, 0) is constant
    # across all inner steps -> each PE row-tile is DMA'd from HBM exactly once.
    grid = (grid_r, grid_b)

    out = pl.pallas_call(
        _pe_add_kernel,
        out_shape=jax.ShapeDtypeStruct((B, rows, _LANE), x.dtype),
        grid_spec=pltpu.PrefetchScalarGridSpec(
            num_scalar_prefetch=0,
            grid=grid,
            in_specs=[
                # activations: tb batches x tile_rows x 128 lanes
                pl.BlockSpec((tb, tile_rows, _LANE), lambda r, b: (b, r, 0)),
                # PE tile: independent of the (inner) batch axis -> resident.
                pl.BlockSpec((tile_rows, _LANE), lambda r, b: (r, 0)),
            ],
            out_specs=pl.BlockSpec((tb, tile_rows, _LANE), lambda r, b: (b, r, 0)),
        ),
        compiler_params=pltpu.CompilerParams(
            dimension_semantics=("parallel", "parallel"),
            vmem_limit_bytes=32 * 1024 * 1024,
        ),
        input_output_aliases=({0: 0} if donate_input else {}),
    )(x_k, pe_k)

    out = out.reshape(B, n_pad)
    if n_pad != n:
        out = out[:, :n]
    return out.reshape(B, S, D)


# ---------------------------------------------------------------------------
# Demo / self-test
# ---------------------------------------------------------------------------
if __name__ == "__main__":
    embeddingDim, numTokens = 32, 120
    pe_table = make_positional_encoding(embeddingDim=embeddingDim,
                                        numTokens=numTokens,
                                        n=10.0, maxDeviation=0.1)

    key = jax.random.PRNGKey(0)
    k1, k2 = jax.random.split(key)

    # Case 1: lane-dense fold path (S*D is a multiple of 128).
    b1, s1 = 2, 8
    x1 = jax.random.normal(k1, (b1, s1, embeddingDim), dtype=jnp.float32)
    out1 = jax.block_until_ready(positional_encoding_forward(x1, pe_table))
    ref1 = x1 + pe_table[:s1, :]
    assert out1.shape == (b1, s1, embeddingDim)
    assert jnp.allclose(out1, ref1, atol=1e-6, rtol=1e-6), "case 1 mismatch vs reference"

    # Case 2: padded fallback path (S*D not a multiple of 128).
    b2, s2 = 3, 7
    x2 = jax.random.normal(k2, (b2, s2, embeddingDim), dtype=jnp.float32)
    out2 = jax.block_until_ready(positional_encoding_forward(x2, pe_table))
    ref2 = x2 + pe_table[:s2, :]
    assert out2.shape == (b2, s2, embeddingDim)
    assert jnp.allclose(out2, ref2, atol=1e-6, rtol=1e-6), "case 2 mismatch vs reference"

    print("KERNEL_OK")
</pallas_src>

<mosaic_0001>
module attributes {stable_mosaic.version = 11 : i64} {
  func.func @_pe_add_kernel(%arg0: i32, %arg1: i32, %arg2: memref<2x2x128xf32, #tpu.memory_space<vmem>>, %arg3: memref<2x128xf32, #tpu.memory_space<vmem>>, %arg4: memref<2x2x128xf32, #tpu.memory_space<vmem>>) attributes {dimension_semantics = [#tpu.dimension_semantics<parallel>, #tpu.dimension_semantics<parallel>], iteration_bounds = array<i64: 1, 1>, scalar_prefetch = 0 : i64, scratch_operands = 0 : i64, tpu.core_type = #tpu.core_type<tc>, window_params = [{transform_indices = @transform_0, window_bounds = array<i64: 2, 2, 128>}, {transform_indices = @transform_1, window_bounds = array<i64: 2, 128>}, {transform_indices = @transform_2, window_bounds = array<i64: 2, 2, 128>}]} {
    %c0 = arith.constant 0 : index
    %c0_0 = arith.constant 0 : index
    %c0_1 = arith.constant 0 : index
    %0 = vector.load %arg2[%c0, %c0_0, %c0_1] : memref<2x2x128xf32, #tpu.memory_space<vmem>>, vector<2x2x128xf32>
    %c0_2 = arith.constant 0 : index
    %c0_3 = arith.constant 0 : index
    %1 = vector.load %arg3[%c0_2, %c0_3] : memref<2x128xf32, #tpu.memory_space<vmem>>, vector<2x128xf32>
    %2 = vector.shape_cast %1 : vector<2x128xf32> to vector<1x2x128xf32>
    %3 = vector.broadcast %2 : vector<1x2x128xf32> to vector<2x2x128xf32>
    %4 = arith.addf %0, %3 : vector<2x2x128xf32>
    %c0_4 = arith.constant 0 : index
    %c0_5 = arith.constant 0 : index
    %c0_6 = arith.constant 0 : index
    %5 = vector.load %arg4[%c0_4, %c0_5, %c0_6] : memref<2x2x128xf32, #tpu.memory_space<vmem>>, vector<2x2x128xf32>
    tpu.vector_store %arg4[%c0_4, %c0_5, %c0_6], %4 {strides = array<i32>} : memref<2x2x128xf32, #tpu.memory_space<vmem>>, vector<2x2x128xf32>,
    return
  }
  func.func @transform_0(%arg0: i32, %arg1: i32) -> (i32, i32, i32) {
    %c0_i32 = arith.constant 0 : i32
    %c0_i32_0 = arith.constant 0 : i32
    return %arg1, %arg0, %c0_i32 : i32, i32, i32
  }
  func.func @transform_1(%arg0: i32, %arg1: i32) -> (i32, i32) {
    %c0_i32 = arith.constant 0 : i32
    %c0_i32_0 = arith.constant 0 : i32
    return %arg0, %c0_i32 : i32, i32
  }
  func.func @transform_2(%arg0: i32, %arg1: i32) -> (i32, i32, i32) {
    %c0_i32 = arith.constant 0 : i32
    %c0_i32_0 = arith.constant 0 : i32
    return %arg1, %arg0, %c0_i32 : i32, i32, i32
  }
}

</mosaic_0001>

<bundles_post_ra>
// kernel: tpu_custom_call.1
= control target key start
LH: loop header
LB: loop body
LE: loop exit
PB: predicated region body
PF: predicated region fallthrough
CT: control target
= control target key end

     0   :  { %7 = vsyncpa [#allocation3], 0  ;;  %s154_s0 = inlined_call_operand.hbm [shape: f32[2,2,128], index: 0, kind: input, shape index: {}]   ;;  %s155_s1 = inlined_call_operand.vmem [shape: f32[2,128], index: 1, kind: input, shape index: {}]   ;;  %s156_s2 = inlined_call_operand.hbm [shape: f32[2,2,128], index: 2, kind: output, shape index: {}]  }
   0x1   :  { %8 = vsyncpa [#allocation4], 0  ;;  %s102_s9 = smov [#allocation2]   ;;  %s54_s13 = scalar_lea.hbm %s154_s0, 64 }
   0x2   :  { %s14_s10 = sshll.u32 %s102_s9, 4  ;;  %p55_p0 = scmp.ne.s32.totalorder %s154_s0, %s54_s13  ;;  %s15_s10 = int_to_ptr.vmem [resolvable:$true] %s14_s10 }
   0x3   :  { %p58_p1 = scmp.lt.u32.totalorder %s54_s13, %s154_s0 }
   0x5   :  { %p60_p2 = pnand %p58_p1, %p55_p0 }
   0x7   :  { %63 = shalt.err (!%p60_p2)
}
   0x8   :  { %s64_s18 = scalar_lea.vmem %s15_s10, 64  ;;  %p69_p4 = scmp.lt.s32.totalorder %s15_s10, %s15_s10 }
   0x9   :  { %p65_p3 = scmp.ne.s32.totalorder %s15_s10, %s64_s18  ;;  %p70_p5 = scmp.lt.s32.totalorder %s64_s18, %s64_s18 }
   0xb   :  { %p71_p6 = por %p70_p5, %p69_p4 }
   0xd   :  { %p72_p7 = pnand %p71_p6, %p65_p3 }
   0xf   :  { %75 = shalt.err (!%p72_p7)
}
  0x10   :  { %s103_s19 = smov 32   ;;  %s104_s20 = smov 2  }
  0x11   :  { %20 = dma.hbm_to_vmem [thread:$0]  %s154_s0, 64, %s15_s10, [#allocation3], %s103_s19, %s103_s19, %s104_s20  }
  0x12   :  { %98 = dma.done.wait [#allocation3], 64  }
  0x13   :  { %99 = vsyncadd [#allocation3], 4294967232  ;;  %s105_s23 = smov [#allocation5]   ;;  %v26_v0 = vld [vmem:[#allocation2] sm:$0x3] }
  0x14   :  { %s38_s24 = sshll.u32 %s105_s23, 4  ;;  %v28_v1 = vld [vmem:[%s155_s1] sm:$0x3]  ;;  %v27_v2 = vld [vmem:[#allocation2 + $0x2] sm:$0x3]  ;;  %s39_s24 = int_to_ptr.vmem [resolvable:$true] %s38_s24 }
  0x15   :  { %v29_v3 = vadd.f32 %v28_v1, %v26_v0  ;;  %v30_v4 = vadd.f32 %v28_v1, %v27_v2  ;;  %s76_s27 = scalar_lea.vmem %s39_s24, 64  ;;  %p81_p9 = scmp.lt.s32.totalorder %s39_s24, %s39_s24 }
  0x16   :  { %p77_p8 = scmp.ne.s32.totalorder %s39_s24, %s76_s27  ;;  %p82_p10 = scmp.lt.s32.totalorder %s76_s27, %s76_s27 }
  0x17   :  { %31 = vst [vmem:[#allocation5] sm:$0x3] %v29_v3  ;;  %32 = vst [vmem:[#allocation5 + $0x2] sm:$0x3] %v30_v4 }
  0x18   :  { %p83_p11 = por %p82_p10, %p81_p9 }
  0x1a   :  { %p84_p12 = pnand %p83_p11, %p77_p8 }
  0x1c   :  { %87 = shalt.err (!%p84_p12)
}
  0x1d   :  { %s88_s29 = scalar_lea.hbm %s156_s2, 64 }
  0x1e   :  { %p89_p13 = scmp.ne.s32.totalorder %s156_s2, %s88_s29  ;;  %p92_p0 = scmp.lt.u32.totalorder %s88_s29, %s156_s2 }
  0x20   :  { %p94_p1 = pnand %p92_p0, %p89_p13 }
  0x22   :  { %97 = shalt.err (!%p94_p1)
}
  0x23   :  { %44 = dma.vmem_to_hbm [thread:$0]  %s39_s24, 64, %s156_s2, [#allocation4], %s103_s19, %s103_s19, %s104_s20  }
  0x24   :  { %100 = dma.done.wait [#allocation4], 64  }
  0x25   :  { %101 = vsyncadd [#allocation4], 4294967232 }
  0x26   :  { %48 = vsyncpa [#allocation3], 1 }
  0x27   :  { %49 = vsyncpa [#allocation4], 1 }

</bundles_post_ra>
